<compile_context>
chip_gen: v7x
topology: tpu7x:2x2x1
jax: 0.10.0
libtpu: 0.0.40
codegen_flags: <defaults>
</compile_context>

<pallas_src>
import jax
import jax.numpy as jnp
from jax.experimental import pallas as pl
from jax.experimental.pallas import tpu as pltpu


def attention_kernel(x_ref, w_ref, b_ref, ctx_ref, attn_ref):
    # x_ref:    (TB, S, D)  TB sequences per grid step (batch-vectorized)
    # w_ref:    (1, D)      linear weight row (VMEM), broadcast over TB and S
    # b_ref:    (1, 1)      linear bias (SMEM scalar)
    # ctx_ref:  (TB, D)     output context vectors
    # attn_ref: (TB, S)     output attention weights (lane-dense, no trailing 1)
    x = x_ref[...].astype(jnp.float32)               # (TB, S, D)
    w = w_ref[...].astype(jnp.float32)               # (1, D) -> broadcasts (1,1,D)
    bias = b_ref[0, 0]                               # SMEM scalar

    # Linear(D -> 1): VPU multiply + XLU lane reduction (no MXU for N=1).
    scores = jnp.sum(x * w, axis=-1) + bias          # (TB, S)

    # softmax over the sequence axis (torch dim=1), max-subtracted.
    m = jnp.max(scores, axis=-1, keepdims=True)      # (TB, 1)
    e = jnp.exp(scores - m)                          # (TB, S)
    denom = jnp.sum(e, axis=-1, keepdims=True)       # (TB, 1)
    attn = e / denom                                 # (TB, S)

    # Weighted sum over the sequence: VPU broadcast-multiply + sublane reduce.
    ctx = jnp.sum(attn[..., None] * x, axis=1)       # (TB, D)

    ctx_ref[...] = ctx.astype(ctx_ref.dtype)
    attn_ref[...] = attn.astype(attn_ref.dtype)


def attention_forward(x, w, b, *, block_b=512):
    """x: (B, S, D), w: (D, 1), b: (1, 1).

    Returns (context (B, D), attention_weights (B, S, 1)), matching the
    PyTorch module's forward.
    """
    B, S, D = x.shape
    tb = min(block_b, B)
    n_blocks = pl.cdiv(B, tb)
    Bp = n_blocks * tb
    if Bp != B:
        # Padded rows are all-zero: their softmax is uniform (no NaNs) and they
        # are sliced away below.
        x = jnp.pad(x, ((0, Bp - B), (0, 0), (0, 0)))

    w_row = w.reshape(1, D)  # lane-dense weight row

    ctx, attn = pl.pallas_call(
        attention_kernel,
        out_shape=(
            jax.ShapeDtypeStruct((Bp, D), x.dtype),
            jax.ShapeDtypeStruct((Bp, S), x.dtype),   # lane-dense, no trailing 1
        ),
        grid=(n_blocks,),
        in_specs=[
            pl.BlockSpec((tb, S, D), lambda i: (i, 0, 0)),
            pl.BlockSpec((1, D), lambda i: (0, 0)),
            pl.BlockSpec(memory_space=pltpu.MemorySpace.SMEM),
        ],
        out_specs=(
            pl.BlockSpec((tb, D), lambda i: (i, 0)),
            pl.BlockSpec((tb, S), lambda i: (i, 0)),
        ),
        compiler_params=pltpu.CompilerParams(
            dimension_semantics=("parallel",)),
    )(x, w_row, b)

    ctx = ctx[:B]
    attn = attn[:B].reshape(B, S, 1)   # match torch's (B, S, 1) return shape
    return ctx, attn


def reference_forward(x, w, b):
    scores = jnp.einsum("bsd,do->bso", x, w) + b[None, :, :]   # (B, S, 1)
    attn = jax.nn.softmax(scores, axis=1)
    ctx = jnp.sum(attn * x, axis=1)
    return ctx, attn


if __name__ == "__main__":
    hidden_dim = 16
    S, D = 8, 2 * hidden_dim  # D = hidden_dim * 2 (bi-LSTM output width)

    key = jax.random.PRNGKey(0)
    kx, kw, kb, kx2 = jax.random.split(key, 4)

    # Deterministic nn.Linear(2H, 1) init: uniform(-1/sqrt(D), 1/sqrt(D))
    bound = 1.0 / (D ** 0.5)
    w = jax.random.uniform(kw, (D, 1), jnp.float32, minval=-bound, maxval=bound)
    b = jax.random.uniform(kb, (1, 1), jnp.float32, minval=-bound, maxval=bound)

    # Small shape consistent with the module (single grid step).
    B = 2
    x = jax.random.normal(kx, (B, S, D), dtype=jnp.float32)
    ctx, attn = attention_forward(x, w, b)
    jax.block_until_ready((ctx, attn))
    ctx_ref, attn_ref = reference_forward(x, w, b)
    assert jnp.allclose(ctx, ctx_ref, atol=1e-5, rtol=1e-5)
    assert jnp.allclose(attn, attn_ref, atol=1e-5, rtol=1e-5)

    # Larger batch: exercises the batched (TB=512) blocks, multi-step grid and
    # the batch-padding path.
    B2 = 1000
    x2 = jax.random.normal(kx2, (B2, S, D), dtype=jnp.float32)
    ctx2, attn2 = attention_forward(x2, w, b)
    jax.block_until_ready((ctx2, attn2))
    ctx2_ref, attn2_ref = reference_forward(x2, w, b)
    assert jnp.allclose(ctx2, ctx2_ref, atol=1e-5, rtol=1e-5)
    assert jnp.allclose(attn2, attn2_ref, atol=1e-5, rtol=1e-5)

    print("KERNEL_OK")
</pallas_src>

<mosaic_0001>
module attributes {stable_mosaic.version = 11 : i64} {
  func.func @attention_kernel(%arg0: i32, %arg1: memref<2x8x32xf32, #tpu.memory_space<vmem>>, %arg2: memref<1x32xf32, #tpu.memory_space<vmem>>, %arg3: memref<1x1xf32, #tpu.memory_space<smem>>, %arg4: memref<2x32xf32, #tpu.memory_space<vmem>>, %arg5: memref<2x8xf32, #tpu.memory_space<vmem>>) attributes {dimension_semantics = [#tpu.dimension_semantics<parallel>], iteration_bounds = array<i64: 1>, scalar_prefetch = 0 : i64, scratch_operands = 0 : i64, tpu.core_type = #tpu.core_type<tc>, window_params = [{transform_indices = @transform_0, window_bounds = array<i64: 2, 8, 32>}, {pipeline_mode = #tpu.pipeline_mode<synchronous>, transform_indices = @transform_1, window_bounds = array<i64: 1, 32>}, {transform_indices = @transform_2, window_bounds = array<i64: 1, 1>}, {transform_indices = @transform_3, window_bounds = array<i64: 2, 32>}, {transform_indices = @transform_4, window_bounds = array<i64: 2, 8>}]} {
    %c0 = arith.constant 0 : index
    %c0_0 = arith.constant 0 : index
    %c0_1 = arith.constant 0 : index
    %0 = vector.load %arg1[%c0, %c0_0, %c0_1] : memref<2x8x32xf32, #tpu.memory_space<vmem>>, vector<2x8x32xf32>
    %c0_2 = arith.constant 0 : index
    %c0_3 = arith.constant 0 : index
    %1 = vector.load %arg2[%c0_2, %c0_3] : memref<1x32xf32, #tpu.memory_space<vmem>>, vector<1x32xf32>
    %c0_4 = arith.constant 0 : index
    %c0_5 = arith.constant 0 : index
    %2 = memref.load %arg3[%c0_4, %c0_5] : memref<1x1xf32, #tpu.memory_space<smem>>
    %3 = vector.shape_cast %1 : vector<1x32xf32> to vector<1x1x32xf32>
    %4 = vector.broadcast %3 : vector<1x1x32xf32> to vector<2x8x32xf32>
    %5 = arith.mulf %0, %4 : vector<2x8x32xf32>
    %cst = arith.constant dense<0.000000e+00> : vector<2x8xf32>
    %6 = vector.multi_reduction <add>, %5, %cst [2] : vector<2x8x32xf32> to vector<2x8xf32>
    %7 = vector.broadcast %2 : f32 to vector<2x8xf32>
    %8 = arith.addf %6, %7 : vector<2x8xf32>
    %cst_6 = arith.constant dense<0xFF800000> : vector<2xf32>
    %9 = vector.multi_reduction <maximumf>, %8, %cst_6 [1] : vector<2x8xf32> to vector<2xf32>
    %10 = vector.shape_cast %9 : vector<2xf32> to vector<2x1xf32>
    %11 = vector.broadcast %10 : vector<2x1xf32> to vector<2x8xf32>
    %12 = arith.subf %8, %11 : vector<2x8xf32>
    %13 = math.exp %12 : vector<2x8xf32>
    %cst_7 = arith.constant dense<0.000000e+00> : vector<2xf32>
    %14 = vector.multi_reduction <add>, %13, %cst_7 [1] : vector<2x8xf32> to vector<2xf32>
    %15 = vector.shape_cast %14 : vector<2xf32> to vector<2x1xf32>
    %16 = vector.broadcast %15 : vector<2x1xf32> to vector<2x8xf32>
    %17 = arith.divf %13, %16 : vector<2x8xf32>
    %18 = vector.shape_cast %17 : vector<2x8xf32> to vector<2x8x1xf32>
    %19 = vector.broadcast %18 : vector<2x8x1xf32> to vector<2x8x32xf32>
    %20 = arith.mulf %19, %0 : vector<2x8x32xf32>
    %cst_8 = arith.constant dense<0.000000e+00> : vector<2x32xf32>
    %21 = vector.multi_reduction <add>, %20, %cst_8 [1] : vector<2x8x32xf32> to vector<2x32xf32>
    %c0_9 = arith.constant 0 : index
    %c0_10 = arith.constant 0 : index
    %22 = vector.load %arg4[%c0_9, %c0_10] : memref<2x32xf32, #tpu.memory_space<vmem>>, vector<2x32xf32>
    tpu.vector_store %arg4[%c0_9, %c0_10], %21 {strides = array<i32>} : memref<2x32xf32, #tpu.memory_space<vmem>>, vector<2x32xf32>,
    %c0_11 = arith.constant 0 : index
    %c0_12 = arith.constant 0 : index
    %23 = vector.load %arg5[%c0_11, %c0_12] : memref<2x8xf32, #tpu.memory_space<vmem>>, vector<2x8xf32>
    tpu.vector_store %arg5[%c0_11, %c0_12], %17 {strides = array<i32>} : memref<2x8xf32, #tpu.memory_space<vmem>>, vector<2x8xf32>,
    return
  }
  func.func @transform_0(%arg0: i32) -> (i32, i32, i32) {
    %c0_i32 = arith.constant 0 : i32
    %c0_i32_0 = arith.constant 0 : i32
    %c0_i32_1 = arith.constant 0 : i32
    return %arg0, %c0_i32, %c0_i32_0 : i32, i32, i32
  }
  func.func @transform_1(%arg0: i32) -> (i32, i32) {
    %c0_i32 = arith.constant 0 : i32
    %c0_i32_0 = arith.constant 0 : i32
    %c0_i32_1 = arith.constant 0 : i32
    return %c0_i32, %c0_i32_0 : i32, i32
  }
  func.func @transform_2(%arg0: i32) -> (i32, i32) {
    %c0_i32 = arith.constant 0 : i32
    %c0_i32_0 = arith.constant 0 : i32
    %c0_i32_1 = arith.constant 0 : i32
    return %c0_i32, %c0_i32_0 : i32, i32
  }
  func.func @transform_3(%arg0: i32) -> (i32, i32) {
    %c0_i32 = arith.constant 0 : i32
    %c0_i32_0 = arith.constant 0 : i32
    return %arg0, %c0_i32 : i32, i32
  }
  func.func @transform_4(%arg0: i32) -> (i32, i32) {
    %c0_i32 = arith.constant 0 : i32
    %c0_i32_0 = arith.constant 0 : i32
    return %arg0, %c0_i32 : i32, i32
  }
}

</mosaic_0001>

<bundles_post_ra>
// kernel: tpu_custom_call.1
= control target key start
LH: loop header
LB: loop body
LE: loop exit
PB: predicated region body
PF: predicated region fallthrough
CT: control target
= control target key end

     0   :  { %11 = vsyncpa [#allocation4], 0  ;;  %s380_s0 = inlined_call_operand.hbm [shape: f32[2,8,32], index: 0, kind: input, shape index: {}]   ;;  %s381_s1 = inlined_call_operand.vmem [shape: f32[1,32], index: 1, kind: input, shape index: {}]   ;;  %s382_s2 = inlined_call_operand.<no memory space> [shape: f32[1,1], index: 2, kind: input, shape index: {}]   ;;  %s383_s3 = inlined_call_operand.hbm [shape: f32[2,32], index: 3, kind: output, shape index: {0}]   ;;  %s384_s4 = inlined_call_operand.hbm [shape: f32[2,8], index: 4, kind: output, shape index: {1}]  }
   0x1   :  { %12 = vsyncpa [#allocation5], 0 }
   0x2   :  { %13 = vsyncpa [#allocation8], 0  ;;  %s288_s15 = smov [#allocation3]   ;;  %s216_s19 = scalar_lea.hbm %s380_s0, 256 }
   0x3   :  { %s19_s16 = sshll.u32 %s288_s15, 4  ;;  %p217_p0 = scmp.ne.s32.totalorder %s380_s0, %s216_s19  ;;  %s20_s16 = int_to_ptr.vmem [resolvable:$true] %s19_s16 }
   0x4   :  { %p220_p1 = scmp.lt.u32.totalorder %s216_s19, %s380_s0 }
   0x6   :  { %p222_p2 = pnand %p220_p1, %p217_p0 }
   0x8   :  { %225 = shalt.err (!%p222_p2)
}
   0x9   :  { %s226_s24 = scalar_lea.vmem %s20_s16, 256  ;;  %p231_p4 = scmp.lt.s32.totalorder %s20_s16, %s20_s16 }
   0xa   :  { %p227_p3 = scmp.ne.s32.totalorder %s20_s16, %s226_s24  ;;  %p232_p5 = scmp.lt.s32.totalorder %s226_s24, %s226_s24 }
   0xc   :  { %p233_p6 = por %p232_p5, %p231_p4 }
   0xe   :  { %p234_p7 = pnand %p233_p6, %p227_p3 }
  0x10   :  { %237 = shalt.err (!%p234_p7)
}
  0x11   :  { %s289_s25 = smov 128   ;;  %s290_s26 = smov 8  }
  0x12   :  { %25 = dma.hbm_to_vmem [thread:$0]  %s380_s0, 256, %s20_s16, [#allocation4], %s289_s25, %s289_s25, %s290_s26  }
  0x13   :  { %282 = dma.done.wait [#allocation4], 256  }
  0x14   :  { %283 = vsyncadd [#allocation4], 4294967040  ;;  %v331_v0 = vld [vmem:[#allocation3] sm:$0xff]  ;;  %vm45_vm0 = vcmask 261120   ;;  %v336_v2 = vld [vmem:[#allocation3 + $0x8] sm:$0xff]  ;;  %v57_v7 = vlaneseq  ;;  %v52_v10 = vstv %s382_s2  ;;  %vm67_vm1 = vcmask 1041409  }
  0x15   :  { %v199_v1 = vld [vmem:[%s381_s1] ss:$0 sm:$0xff]  ;;  %vm70_vm2 = vcmask 58368   ;;  %v291_v20 = vmov 0   ;;  %s292_s1 = smov [#allocation7]  }
  0x16   :  { %v43_v3 = vmul.f32 %v199_v1, %v331_v0  ;;  %v44_v4 = vmul.f32 %v199_v1, %v336_v2  ;;  %v58_v8 = vand.u32 127, %v57_v7  ;;  %v60_v9 = vshrl.u32 %v57_v7, 7  ;;  %207 = vset.pattern.permute.xlu0 %v291_v20  ;;  %206 = vset.pattern.permute.xlu1 %v291_v20  ;;  %s186_s2 = sshll.u32 %s292_s1, 4  ;;  %s187_s2 = int_to_ptr.vmem [resolvable:$true] %s186_s2 }
  0x17   :  { %s238_s6 = scalar_lea.vmem %s187_s2, 32  ;;  %p243_p9 = scmp.lt.s32.totalorder %s187_s2, %s187_s2 }
  0x18   :  { %v46_v5 = vsel %vm45_vm0, %v43_v3, 0.0  ;;  %v49_v6 = vsel %vm45_vm0, %v44_v4, 0.0  ;;  %v61_v12 = vsub.s32 %v58_v8, %v60_v9  ;;  %v77_v21 = vsub.s32 0, %v60_v9  ;;  %p239_p8 = scmp.ne.s32.totalorder %s187_s2, %s238_s6  ;;  %p244_p10 = scmp.lt.s32.totalorder %s238_s6, %s238_s6 }
  0x19   :  { %47 = vadd.xlane.f32.xlu0 %v46_v5  ;;  %v81_v22 = vsub.s32 1, %v60_v9 }
  0x1a   :  { %p245_p11 = por %p244_p10, %p243_p9 }
  0x1c   :  { %p246_p12 = pnand %p245_p11, %p239_p8 }
  0x1d   :  { %50 = vadd.xlane.f32.xlu0 %v49_v6 }
  0xa6   :  { %v48_v11 = vpop.xlane.xlu0 %47 }
  0xa7   :  { %v53_v13 = vadd.f32 %v52_v10, %v48_v11 }
  0xa9   :  { %v62_v16 = vrot.slane %v53_v13, %v61_v12 }
  0xaa   :  { %v51_v14 = vpop.xlane.xlu0 %50 }
  0xab   :  { %v54_v15 = vadd.f32 %v52_v10, %v51_v14 }
  0xad   :  { %v66_v17 = vrot.slane %v54_v15, %v61_v12 }
  0xaf   :  { %v68_v18 = vsel %vm67_vm1, %v66_v17, %v62_v16 }
  0xb0   :  { %v71_v19 = vsel %vm70_vm2, %v68_v18, -inf }
  0xb1   :  { %72 = vmax.xlane.f32.xlu1 %v71_v19 }
 0x13e   :  { %v73_v23 = vpop.xlane.xlu1 %72 }
 0x13f   :  { %v78_v24 = vrot.slane %v73_v23, %v77_v21  ;;  %v82_v25 = vrot.slane %v73_v23, %v81_v22 }
 0x141   :  { %v85_v26 = vsub.f32 %v53_v13, %v78_v24  ;;  %v86_v27 = vsub.f32 %v54_v15, %v82_v25 }
 0x143   :  { %v87_v28 = vmul.f32 1.442695, %v85_v26  ;;  %v89_v29 = vmul.f32 1.442695, %v86_v27 }
 0x145   :  { %208 = vpow2.f32 %v87_v28 }
 0x146   :  { %210 = vpow2.f32 %v89_v29 }
 0x14f   :  { %v209_v30 = vpop.eup %208 }
 0x150   :  { %v211_v31 = vpop.eup %210  ;;  %94 = vperm.xlu1 %206, %v209_v30  }
 0x151   :  { %97 = vperm.xlu0 %207, %v211_v31  }
 0x1cf   :  { %v95_v32 = vpop.permute.xlu1 %94 }
 0x1d0   :  { %v98_v33 = vpop.permute.xlu0 %97  ;;  %v102_v34 = vrot.slane %v95_v32, %v61_v12 }
 0x1d1   :  { %v106_v35 = vrot.slane %v98_v33, %v61_v12 }
 0x1d3   :  { %v107_v36 = vsel %vm67_vm1, %v106_v35, %v102_v34 }
 0x1d4   :  { %v109_v37 = vsel %vm70_vm2, %v107_v36, 0.0 }
 0x1d5   :  { %110 = vadd.xlane.f32.xlu1 %v109_v37 }
 0x262   :  { %v111_v38 = vpop.xlane.xlu1 %110 }
 0x263   :  { %v116_v39 = vrot.slane %v111_v38, %v77_v21  ;;  %v120_v40 = vrot.slane %v111_v38, %v81_v22 }
 0x265   :  { %212 = vrcp.f32 %v116_v39 }
 0x266   :  { %214 = vrcp.f32 %v120_v40 }
 0x26f   :  { %v213_v41 = vpop.eup %212 }
 0x270   :  { %v124_v42 = vmul.f32 %v213_v41, %v209_v30  ;;  %v215_v43 = vpop.eup %214 }
 0x271   :  { %v126_v44 = vmul.f32 %v215_v43, %v211_v31 }
 0x272   :  { %129 = vperm.xlu0 %207, %v124_v42  }
 0x276   :  { %134 = vperm.xlu0 %207, %v126_v44  }
 0x2f1   :  { %v130_v45 = vpop.permute.xlu0 %129 }
 0x2f2   :  { %v137_v46 = vmul.f32 %v130_v45, %v331_v0  ;;  %v162_v50 = vrot.slane %v130_v45, %v61_v12 }
 0x2f4   :  { %v139_v47 = vsel %vm45_vm0, %v137_v46, 0.0 }
 0x2f5   :  { %v140_v48 = vrot.slane %v139_v47, 4  ;;  %v135_v49 = vpop.permute.xlu0 %134 }
 0x2f6   :  { %v138_v51 = vmul.f32 %v135_v49, %v336_v2  ;;  %v166_v52 = vrot.slane %v135_v49, %v61_v12 }
 0x2f7   :  { %v141_v53 = vadd.f32 %v140_v48, %v139_v47 }
 0x2f8   :  { %v146_v54 = vsel %vm45_vm0, %v138_v51, 0.0  ;;  %v167_v55 = vsel %vm67_vm1, %v166_v52, %v162_v50 }
 0x2f9   :  { %v142_v56 = vrot.slane %v141_v53, 2  ;;  %v147_v57 = vrot.slane %v146_v54, 4  ;;  %169 = vst.msk [vmem:[#allocation7] sm:$0x3] %vm70_vm2, %v167_v55 }
 0x2fa   :  { %249 = shalt.err (!%p246_p12)
}
 0x2fb   :  { %s250_s9 = scalar_lea.hbm %s384_s4, 32 }
 0x2fc   :  { %p251_p13 = scmp.ne.s32.totalorder %s384_s4, %s250_s9  ;;  %p254_p0 = scmp.lt.u32.totalorder %s250_s9, %s384_s4 }
 0x2fe   :  { %p256_p1 = pnand %p254_p0, %p251_p13 }
 0x300   :  { %259 = shalt.err (!%p256_p1)
}
 0x301   :  { %189 = dma.vmem_to_hbm [thread:$0]  %s187_s2, 32, %s384_s4, [#allocation8]   ;;  %v143_v58 = vadd.f32 %v142_v56, %v141_v53  ;;  %v148_v59 = vadd.f32 %v147_v57, %v146_v54  ;;  %vm157_vm3 = vcmask 254976  }
 0x302   :  { %s293_s16 = smov [#allocation6]  }
 0x303   :  { %v149_v60 = vrot.slane %v148_v59, 2  ;;  %v144_v61 = vrot.slane %v143_v58, 1  ;;  %s176_s17 = sshll.u32 %s293_s16, 4  ;;  %s177_s17 = int_to_ptr.vmem [resolvable:$true] %s176_s17 }
 0x304   :  { %s260_s18 = scalar_lea.vmem %s177_s17, 32  ;;  %p265_p3 = scmp.lt.s32.totalorder %s177_s17, %s177_s17 }
 0x305   :  { %v150_v62 = vadd.f32 %v149_v60, %v148_v59  ;;  %v145_v1 = vadd.f32 %v144_v61, %v143_v58  ;;  %p261_p2 = scmp.ne.s32.totalorder %s177_s17, %s260_s18  ;;  %p266_p4 = scmp.lt.s32.totalorder %s260_s18, %s260_s18 }
 0x307   :  { %v151_v63 = vrot.slane %v150_v62, 1  ;;  %p267_p5 = por %p266_p4, %p265_p3 }
 0x309   :  { %v152_v0 = vadd.f32 %v151_v63, %v150_v62  ;;  %p268_p6 = pnand %p267_p5, %p261_p2 }
 0x30b   :  { %v155_v2 = vsel %vm67_vm1, %v152_v0, %v145_v1 }
 0x30c   :  { %158 = vst.msk [vmem:[#allocation6] sm:$0x3] %vm157_vm3, %v155_v2 }
 0x30d   :  { %271 = shalt.err (!%p268_p6)
}
 0x30e   :  { %s272_s20 = scalar_lea.hbm %s383_s3, 32 }
 0x30f   :  { %p273_p7 = scmp.ne.s32.totalorder %s383_s3, %s272_s20  ;;  %p276_p8 = scmp.lt.u32.totalorder %s272_s20, %s383_s3 }
 0x311   :  { %p278_p9 = pnand %p276_p8, %p273_p7 }
 0x313   :  { %281 = shalt.err (!%p278_p9)
}
 0x314   :  { %179 = dma.vmem_to_hbm [thread:$0]  %s177_s17, 32, %s383_s3, [#allocation5]  }
 0x315   :  { %284 = dma.done.wait [#allocation5], 32  }
 0x316   :  { %285 = vsyncadd [#allocation5], 4294967264 }
 0x317   :  { %286 = dma.done.wait [#allocation8], 32  }
 0x318   :  { %287 = vsyncadd [#allocation8], 4294967264 }
 0x319   :  { %196 = vsyncpa [#allocation4], 1 }
 0x31a   :  { %197 = vsyncpa [#allocation5], 1 }
 0x31b   :  { %198 = vsyncpa [#allocation8], 1 }

</bundles_post_ra>
